<compile_context>
chip_gen: v5e
topology: v5e:2x2
jax: 0.10.0
libtpu: 0.0.40
codegen_flags: <defaults>
</compile_context>

<pallas_src>
import jax
import jax.numpy as jnp
from jax.experimental import pallas as pl
from jax.experimental.pallas import tpu as pltpu


def _round_up(x, m):
    return ((x + m - 1) // m) * m


def _lora_kernel(alpha_ref, x_ref, w_ref, xa_ref, b_ref, o_ref, acc_ref):
    """Grid = (rows i, out-cols j, in_dim reduction k); k is innermost.

    Base path: acc += x_tile @ W_tile, accumulated over k in f32 VMEM.
    LoRA path: xa (= x @ A, precomputed in the wrapper, resident per row tile)
    is up-projected through B and combined once per output tile at k == last.
    """
    k = pl.program_id(2)

    @pl.when(k == 0)
    def _():
        acc_ref[...] = jnp.zeros_like(acc_ref)

    # Base matmul partial on the MXU (f32 accumulate).
    acc_ref[...] += jnp.dot(x_ref[...], w_ref[...],
                            preferred_element_type=jnp.float32)

    @pl.when(k == pl.num_programs(2) - 1)
    def _():
        # LoRA up-projection + combine, once per (i, j) output tile.
        lora = jnp.dot(xa_ref[...], b_ref[...],
                       preferred_element_type=jnp.float32)
        o_ref[...] = (acc_ref[...] + alpha_ref[0, 0] * lora).astype(o_ref.dtype)


def prepare_lora_weights(W, A, B, *, tn=512, tk=1024, dtype=None):
    """Pad / cast the frozen weights ONCE (weight-load time, not per forward).

    Pass dtype=jnp.bfloat16 on v6e/v7x (or v5e) to halve W HBM traffic and use
    the native bf16 MXU path.  # TODO(synk): fp8 W storage for v7x serving.
    """
    in_dim, out_dim = W.shape
    rank = A.shape[1]
    assert A.shape[0] == in_dim and B.shape == (rank, out_dim)

    if dtype is not None:
        W, A, B = W.astype(dtype), A.astype(dtype), B.astype(dtype)

    # Clamp target tiles to the hardware-aligned problem size so toy shapes
    # collapse to a 1-step grid instead of paying for giant zero padding.
    tn = min(tn, _round_up(out_dim, 128))
    tk = min(tk, _round_up(in_dim, 128))
    r_pad = _round_up(rank, 128)          # lane-dense LoRA intermediate

    out_pad = _round_up(out_dim, tn)
    in_pad = _round_up(in_dim, tk)

    # Zero padding is numerically exact (padded rows/cols contribute nothing).
    W_p = jnp.pad(W, ((0, in_pad - in_dim), (0, out_pad - out_dim)))
    B_p = jnp.pad(B, ((0, r_pad - rank), (0, out_pad - out_dim)))

    return dict(W_p=W_p, A=A, B_p=B_p,
                in_dim=in_dim, out_dim=out_dim, rank=rank, r_pad=r_pad,
                tn=tn, tk=tk, in_pad=in_pad, out_pad=out_pad)


def lora_forward(x, params, alpha=1.0, *, tm=512):
    N, in_dim = x.shape
    assert in_dim == params["in_dim"]

    W_p, A, B_p = params["W_p"], params["A"], params["B_p"]
    out_dim, rank, r_pad = params["out_dim"], params["rank"], params["r_pad"]
    tn, tk = params["tn"], params["tk"]
    in_pad, out_pad = params["in_pad"], params["out_pad"]
    dt = W_p.dtype

    # Sublane granularity depends on dtype (f32: 8, bf16: 16, int8/fp8: 32).
    sub = {1: 32, 2: 16, 4: 8}[jnp.dtype(dt).itemsize]
    tm = min(tm, _round_up(N, sub))
    N_pad = _round_up(N, tm)

    x_c = x.astype(dt)
    # Hoisted LoRA down-projection: computed ONCE per call (tiny N x rank
    # matmul) and shared across every output-column tile in the kernel.
    xa = jnp.dot(x_c, A, preferred_element_type=jnp.float32).astype(dt)

    # Only the activation-side pads happen per call (cheap).
    x_p = jnp.pad(x_c, ((0, N_pad - N), (0, in_pad - in_dim)))
    xa_p = jnp.pad(xa, ((0, N_pad - N), (0, r_pad - rank)))

    # Runtime scalar in SMEM -> one compiled kernel for any alpha value.
    alpha_arr = jnp.asarray(alpha, dtype=jnp.float32).reshape(1, 1)

    grid = (N_pad // tm, out_pad // tn, in_pad // tk)

    out = pl.pallas_call(
        _lora_kernel,
        out_shape=jax.ShapeDtypeStruct((N_pad, out_pad), dt),
        grid_spec=pltpu.PrefetchScalarGridSpec(
            num_scalar_prefetch=0,
            grid=grid,
            in_specs=[
                pl.BlockSpec(memory_space=pltpu.MemorySpace.SMEM),   # alpha
                pl.BlockSpec((tm, tk), lambda i, j, k: (i, k)),      # x tile
                pl.BlockSpec((tk, tn), lambda i, j, k: (k, j)),      # W tile (streamed)
                pl.BlockSpec((tm, r_pad), lambda i, j, k: (i, 0)),   # xa (per row tile)
                pl.BlockSpec((r_pad, tn), lambda i, j, k: (0, j)),   # B tile
            ],
            out_specs=pl.BlockSpec((tm, tn), lambda i, j, k: (i, j)),
            scratch_shapes=[
                pltpu.VMEM((tm, tn), jnp.float32),   # base accumulator
            ],
        ),
        compiler_params=pltpu.CompilerParams(
            # xa is precomputed, so both i and j are genuinely independent ->
            # safe to megacore-shard either axis on v7x.
            dimension_semantics=("parallel", "parallel", "arbitrary"),
            # ~12 MiB peak at f32 default tiles (double-buffered inputs +
            # accumulator); 48 MiB headroom fits v5e/v6e (128 MiB) and
            # v7x (64 MiB) physical VMEM.
            vmem_limit_bytes=48 * 1024 * 1024,
        ),
    )(alpha_arr, x_p, W_p, xa_p, B_p)

    return out[:N, :out_dim]


if __name__ == "__main__":
    # Small deterministic shapes: batch=8, in_dim=32, out_dim=32, rank=4
    N, in_dim, out_dim, rank = 8, 32, 32, 4
    alpha = 1.0

    key = jax.random.PRNGKey(0)
    kx, kw, ka, kb = jax.random.split(key, 4)
    x = jax.random.normal(kx, (N, in_dim), dtype=jnp.float32)
    W = jax.random.normal(kw, (in_dim, out_dim), dtype=jnp.float32)  # frozen base
    A = jax.random.normal(ka, (in_dim, rank), dtype=jnp.float32)
    B = jax.random.normal(kb, (rank, out_dim), dtype=jnp.float32)

    # Pad/cast frozen weights once (weight-load time), then run the kernel.
    params = prepare_lora_weights(W, A, B)
    out = lora_forward(x, params, alpha=alpha)
    out = jax.block_until_ready(out)

    # Pure-JAX reference check
    ref = x @ W + alpha * ((x @ A) @ B)
    assert out.shape == (N, out_dim)
    assert jnp.allclose(out, ref, atol=1e-4, rtol=1e-4), "mismatch vs reference"

    print("KERNEL_OK")
</pallas_src>

<mosaic_0001>
module attributes {stable_mosaic.version = 11 : i64} {
  func.func @_lora_kernel(%arg0: i32, %arg1: i32, %arg2: i32, %arg3: memref<1x1xf32, #tpu.memory_space<smem>>, %arg4: memref<8x128xf32, #tpu.memory_space<vmem>>, %arg5: memref<128x128xf32, #tpu.memory_space<vmem>>, %arg6: memref<8x128xf32, #tpu.memory_space<vmem>>, %arg7: memref<128x128xf32, #tpu.memory_space<vmem>>, %arg8: memref<8x128xf32, #tpu.memory_space<vmem>>, %arg9: memref<8x128xf32, #tpu.memory_space<vmem>>) attributes {dimension_semantics = [#tpu.dimension_semantics<parallel>, #tpu.dimension_semantics<parallel>, #tpu.dimension_semantics<arbitrary>], iteration_bounds = array<i64: 1, 1, 1>, scalar_prefetch = 0 : i64, scratch_operands = 1 : i64, tpu.core_type = #tpu.core_type<tc>, window_params = [{transform_indices = @transform_0, window_bounds = array<i64: 1, 1>}, {transform_indices = @transform_1, window_bounds = array<i64: 8, 128>}, {transform_indices = @transform_2, window_bounds = array<i64: 128, 128>}, {transform_indices = @transform_3, window_bounds = array<i64: 8, 128>}, {transform_indices = @transform_4, window_bounds = array<i64: 128, 128>}, {transform_indices = @transform_5, window_bounds = array<i64: 8, 128>}]} {
    %c0_i32 = arith.constant 0 : i32
    %0 = arith.cmpi eq, %arg2, %c0_i32 : i32
    %1 = arith.extui %0 : i1 to i32
    %c0_i32_0 = arith.constant 0 : i32
    %2 = arith.cmpi ne, %1, %c0_i32_0 : i32
    scf.if %2 {
      %cst_10 = arith.constant 0.000000e+00 : f32
      %12 = vector.broadcast %cst_10 : f32 to vector<8x128xf32>
      %c0_11 = arith.constant 0 : index
      %c0_12 = arith.constant 0 : index
      %13 = vector.load %arg9[%c0_11, %c0_12] : memref<8x128xf32, #tpu.memory_space<vmem>>, vector<8x128xf32>
      tpu.vector_store %arg9[%c0_11, %c0_12], %12 {strides = array<i32>} : memref<8x128xf32, #tpu.memory_space<vmem>>, vector<8x128xf32>,
    } else {
    }
    %c0 = arith.constant 0 : index
    %c0_1 = arith.constant 0 : index
    %3 = vector.load %arg9[%c0, %c0_1] : memref<8x128xf32, #tpu.memory_space<vmem>>, vector<8x128xf32>
    %c0_2 = arith.constant 0 : index
    %c0_3 = arith.constant 0 : index
    %4 = vector.load %arg4[%c0_2, %c0_3] : memref<8x128xf32, #tpu.memory_space<vmem>>, vector<8x128xf32>
    %c0_4 = arith.constant 0 : index
    %c0_5 = arith.constant 0 : index
    %5 = vector.load %arg5[%c0_4, %c0_5] : memref<128x128xf32, #tpu.memory_space<vmem>>, vector<128x128xf32>
    %cst = arith.constant dense<0.000000e+00> : vector<8x128xf32>
    %6 = tpu.matmul %4, %5, %cst {dimension_numbers = #tpu.dot_dimension_numbers<[1], [0], [0], [1], [0, 0, 1, 1], [], []>} : vector<8x128xf32>, vector<128x128xf32>, vector<8x128xf32> -> vector<8x128xf32>
    %7 = arith.addf %3, %6 : vector<8x128xf32>
    %c0_6 = arith.constant 0 : index
    %c0_7 = arith.constant 0 : index
    %8 = vector.load %arg9[%c0_6, %c0_7] : memref<8x128xf32, #tpu.memory_space<vmem>>, vector<8x128xf32>
    tpu.vector_store %arg9[%c0_6, %c0_7], %7 {strides = array<i32>} : memref<8x128xf32, #tpu.memory_space<vmem>>, vector<8x128xf32>,
    %c0_i32_8 = arith.constant 0 : i32
    %9 = arith.cmpi eq, %arg2, %c0_i32_8 : i32
    %10 = arith.extui %9 : i1 to i32
    %c0_i32_9 = arith.constant 0 : i32
    %11 = arith.cmpi ne, %10, %c0_i32_9 : i32
    scf.if %11 {
      %c0_10 = arith.constant 0 : index
      %c0_11 = arith.constant 0 : index
      %12 = vector.load %arg6[%c0_10, %c0_11] : memref<8x128xf32, #tpu.memory_space<vmem>>, vector<8x128xf32>
      %c0_12 = arith.constant 0 : index
      %c0_13 = arith.constant 0 : index
      %13 = vector.load %arg7[%c0_12, %c0_13] : memref<128x128xf32, #tpu.memory_space<vmem>>, vector<128x128xf32>
      %cst_14 = arith.constant dense<0.000000e+00> : vector<8x128xf32>
      %14 = tpu.matmul %12, %13, %cst_14 {dimension_numbers = #tpu.dot_dimension_numbers<[1], [0], [0], [1], [0, 0, 1, 1], [], []>} : vector<8x128xf32>, vector<128x128xf32>, vector<8x128xf32> -> vector<8x128xf32>
      %c0_15 = arith.constant 0 : index
      %c0_16 = arith.constant 0 : index
      %15 = vector.load %arg9[%c0_15, %c0_16] : memref<8x128xf32, #tpu.memory_space<vmem>>, vector<8x128xf32>
      %c0_17 = arith.constant 0 : index
      %c0_18 = arith.constant 0 : index
      %16 = memref.load %arg3[%c0_17, %c0_18] : memref<1x1xf32, #tpu.memory_space<smem>>
      %17 = vector.broadcast %16 : f32 to vector<8x128xf32>
      %18 = arith.mulf %17, %14 : vector<8x128xf32>
      %19 = arith.addf %15, %18 : vector<8x128xf32>
      %c0_19 = arith.constant 0 : index
      %c0_20 = arith.constant 0 : index
      %20 = vector.load %arg8[%c0_19, %c0_20] : memref<8x128xf32, #tpu.memory_space<vmem>>, vector<8x128xf32>
      tpu.vector_store %arg8[%c0_19, %c0_20], %19 {strides = array<i32>} : memref<8x128xf32, #tpu.memory_space<vmem>>, vector<8x128xf32>,
    } else {
    }
    return
  }
  func.func @transform_0(%arg0: i32, %arg1: i32, %arg2: i32) -> (i32, i32) {
    %c0_i32 = arith.constant 0 : i32
    %c0_i32_0 = arith.constant 0 : i32
    %c0_i32_1 = arith.constant 0 : i32
    return %c0_i32, %c0_i32_0 : i32, i32
  }
  func.func @transform_1(%arg0: i32, %arg1: i32, %arg2: i32) -> (i32, i32) {
    %c0_i32 = arith.constant 0 : i32
    return %arg0, %arg2 : i32, i32
  }
  func.func @transform_2(%arg0: i32, %arg1: i32, %arg2: i32) -> (i32, i32) {
    %c0_i32 = arith.constant 0 : i32
    return %arg2, %arg1 : i32, i32
  }
  func.func @transform_3(%arg0: i32, %arg1: i32, %arg2: i32) -> (i32, i32) {
    %c0_i32 = arith.constant 0 : i32
    %c0_i32_0 = arith.constant 0 : i32
    return %arg0, %c0_i32 : i32, i32
  }
  func.func @transform_4(%arg0: i32, %arg1: i32, %arg2: i32) -> (i32, i32) {
    %c0_i32 = arith.constant 0 : i32
    %c0_i32_0 = arith.constant 0 : i32
    return %c0_i32, %arg1 : i32, i32
  }
  func.func @transform_5(%arg0: i32, %arg1: i32, %arg2: i32) -> (i32, i32) {
    %c0_i32 = arith.constant 0 : i32
    return %arg0, %arg1 : i32, i32
  }
}

</mosaic_0001>

<bundles_post_ra>
// kernel: tpu_custom_call.1
= control target key start
LH: loop header
LB: loop body
LE: loop exit
PB: predicated region body
PF: predicated region fallthrough
CT: control target
= control target key end

     0   :  { %11 = vsyncpa [#allocation5], 0  ;;  %s381_s0 = inlined_call_operand.<no memory space> [shape: f32[1,1], index: 0, kind: input, shape index: {}]   ;;  %s382_s1 = inlined_call_operand.hbm [shape: f32[8,128], index: 1, kind: input, shape index: {}]   ;;  %s383_s2 = inlined_call_operand.hbm [shape: f32[128,128], index: 2, kind: input, shape index: {}]   ;;  %s384_s3 = inlined_call_operand.hbm [shape: f32[8,128], index: 3, kind: input, shape index: {}]   ;;  %s385_s4 = inlined_call_operand.hbm [shape: f32[128,128], index: 4, kind: input, shape index: {}]   ;;  %s386_s5 = inlined_call_operand.hbm [shape: f32[8,128], index: 5, kind: output, shape index: {}]  }
   0x1   :  { %12 = vsyncpa [#allocation8], 0 }
   0x2   :  { %13 = vsyncpa [#allocation11], 0  ;;  %s32_s20 = sshll.u32 %s383_s2, 4  ;;  %s33_s20 = int_to_ptr.hbm [resolvable:$true] %s32_s20 }
   0x3   :  { %14 = vsyncpa [#allocation6], 0  ;;  %s326_s21 = smov [#allocation7]   ;;  %s22_s25 = sshll.u32 %s382_s1, 4  ;;  %s23_s25 = int_to_ptr.hbm [resolvable:$true] %s22_s25 }
   0x4   :  { %s34_s22 = sshll.u32 %s326_s21, 4  ;;  %s327_s26 = smov 128   ;;  %s35_s22 = int_to_ptr.vmem [resolvable:$true] %s34_s22 }
   0x5   :  { %s328_s27 = smov 8   ;;  %s329_s28 = smov [#allocation4]  }
   0x6   :  { %40 = dma.hbm_to_vmem [thread:$0]  %s33_s20, 2048, %s35_s22, [#allocation8], %s327_s26, %s327_s26, %s328_s27  }
   0x7   :  { %s24_s29 = sshll.u32 %s329_s28, 4  ;;  %s46_s7 = sshll.u32 %s384_s3, 4  ;;  %s25_s29 = int_to_ptr.vmem [resolvable:$true] %s24_s29  ;;  %s47_s7 = int_to_ptr.hbm [resolvable:$true] %s46_s7 }
   0x8   :  { %27 = dma.hbm_to_vmem [thread:$0]  %s23_s25, 128, %s25_s29, [#allocation5]  }
   0x9   :  { %s56_s9 = sshll.u32 %s385_s4, 4  ;;  %s330_s10 = smov [#allocation9]   ;;  %s57_s9 = int_to_ptr.hbm [resolvable:$true] %s56_s9 }
   0xa   :  { %s48_s11 = sshll.u32 %s330_s10, 4  ;;  %s331_s1 = smov [#allocation10]   ;;  %s49_s11 = int_to_ptr.vmem [resolvable:$true] %s48_s11 }
   0xb   :  { %51 = dma.hbm_to_vmem [thread:$0]  %s47_s7, 128, %s49_s11, [#allocation8]  }
   0xc   :  { %s58_s12 = sshll.u32 %s331_s1, 4  ;;  %s59_s12 = int_to_ptr.vmem [resolvable:$true] %s58_s12 }
   0xd   :  { %64 = dma.hbm_to_vmem [thread:$0]  %s57_s9, 2048, %s59_s12, [#allocation11], %s327_s26, %s327_s26, %s328_s27  }
   0xe   :  { %318 = dma.done.wait [#allocation5], 128  }
   0xf   :  { %319 = vsyncadd [#allocation5], 4294967168 }
  0x10   :  { %320 = dma.done.wait [#allocation8], 2176  }
  0x11   :  { %321 = vsyncadd [#allocation8], 4294965120 }
  0x12   :  { %322 = dma.done.wait [#allocation11], 2048  }
  0x13   :  { %323 = vsyncadd [#allocation11], 4294965248  ;;  %v145_v0 = vld [vmem:[#allocation10 + $0x78] sm:$0xff]  ;;  %v103_v1 = vld [vmem:[#allocation7 + $0x78] sm:$0xff]  ;;  %v168_v34 = vstv %s381_s0  ;;  %s332_s13 = smov [#allocation12]   ;;  %s179_s17 = sshll.u32 %s386_s5, 4  ;;  %s180_s17 = int_to_ptr.hbm [resolvable:$true] %s179_s17 }
  0x14   :  { %v144_v2 = vld [vmem:[#allocation10 + $0x70] sm:$0xff]  ;;  %146 = vmatpush.msra.mxu1 %v145_v0  ;;  %104 = vmatpush.msra.mxu0 %v103_v1  ;;  %v102_v3 = vld [vmem:[#allocation7 + $0x70] sm:$0xff]  ;;  %v101_v5 = vld [vmem:[#allocation7 + $0x68] sm:$0xff]  ;;  %s177_s14 = sshll.u32 %s332_s13, 4  ;;  %s178_s14 = int_to_ptr.vmem [resolvable:$true] %s177_s14 }
  0x15   :  { %v143_v4 = vld [vmem:[#allocation10 + $0x68] sm:$0xff]  ;;  %v142_v6 = vld [vmem:[#allocation10 + $0x60] sm:$0xff]  ;;  %v100_v7 = vld [vmem:[#allocation7 + $0x60] sm:$0xff] }
  0x16   :  { %147 = vmatpush.msra.mxu1 %v144_v2  ;;  %105 = vmatpush.msra.mxu0 %v102_v3  ;;  %v141_v8 = vld [vmem:[#allocation10 + $0x58] sm:$0xff]  ;;  %v99_v9 = vld [vmem:[#allocation7 + $0x58] sm:$0xff]  ;;  %v98_v11 = vld [vmem:[#allocation7 + $0x50] sm:$0xff] }
  0x17   :  { %v140_v10 = vld [vmem:[#allocation10 + $0x50] sm:$0xff]  ;;  %v139_v12 = vld [vmem:[#allocation10 + $0x48] sm:$0xff]  ;;  %v97_v13 = vld [vmem:[#allocation7 + $0x48] sm:$0xff] }
  0x18   :  { %148 = vmatpush.msra.mxu1 %v143_v4  ;;  %106 = vmatpush.msra.mxu0 %v101_v5  ;;  %v138_v14 = vld [vmem:[#allocation10 + $0x40] sm:$0xff]  ;;  %v96_v15 = vld [vmem:[#allocation7 + $0x40] sm:$0xff]  ;;  %v95_v17 = vld [vmem:[#allocation7 + $0x38] sm:$0xff] }
  0x19   :  { %v137_v16 = vld [vmem:[#allocation10 + $0x38] sm:$0xff]  ;;  %v136_v18 = vld [vmem:[#allocation10 + $0x30] sm:$0xff]  ;;  %v94_v19 = vld [vmem:[#allocation7 + $0x30] sm:$0xff] }
  0x1a   :  { %149 = vmatpush.msra.mxu1 %v142_v6  ;;  %107 = vmatpush.msra.mxu0 %v100_v7  ;;  %v135_v20 = vld [vmem:[#allocation10 + $0x28] sm:$0xff]  ;;  %v93_v21 = vld [vmem:[#allocation7 + $0x28] sm:$0xff]  ;;  %v92_v23 = vld [vmem:[#allocation7 + $0x20] sm:$0xff] }
  0x1b   :  { %v134_v22 = vld [vmem:[#allocation10 + $0x20] sm:$0xff]  ;;  %v133_v24 = vld [vmem:[#allocation10 + $0x18] sm:$0xff]  ;;  %v91_v25 = vld [vmem:[#allocation7 + $0x18] sm:$0xff] }
  0x1c   :  { %150 = vmatpush.msra.mxu1 %v141_v8  ;;  %108 = vmatpush.msra.mxu0 %v99_v9  ;;  %v132_v26 = vld [vmem:[#allocation10 + $0x10] sm:$0xff]  ;;  %v90_v27 = vld [vmem:[#allocation7 + $0x10] sm:$0xff]  ;;  %v89_v29 = vld [vmem:[#allocation7 + $0x8] sm:$0xff] }
  0x1d   :  { %v131_v28 = vld [vmem:[#allocation10 + $0x8] sm:$0xff]  ;;  %v130_v30 = vld [vmem:[#allocation10] sm:$0xff]  ;;  %v88_v31 = vld [vmem:[#allocation7] sm:$0xff] }
  0x1e   :  { %151 = vmatpush.msra.mxu1 %v140_v10  ;;  %109 = vmatpush.msra.mxu0 %v98_v11  ;;  %v129_v32 = vld [vmem:[#allocation9] sm:$0xff]  ;;  %v87_v33 = vld [vmem:[#allocation4] sm:$0xff] }
  0x20   :  { %152 = vmatpush.msra.mxu1 %v139_v12  ;;  %110 = vmatpush.msra.mxu0 %v97_v13 }
  0x22   :  { %153 = vmatpush.msra.mxu1 %v138_v14  ;;  %111 = vmatpush.msra.mxu0 %v96_v15 }
  0x24   :  { %154 = vmatpush.msra.mxu1 %v137_v16  ;;  %112 = vmatpush.msra.mxu0 %v95_v17 }
  0x26   :  { %155 = vmatpush.msra.mxu1 %v136_v18  ;;  %113 = vmatpush.msra.mxu0 %v94_v19 }
  0x28   :  { %156 = vmatpush.msra.mxu1 %v135_v20  ;;  %114 = vmatpush.msra.mxu0 %v93_v21 }
  0x2a   :  { %157 = vmatpush.msra.mxu1 %v134_v22  ;;  %115 = vmatpush.msra.mxu0 %v92_v23 }
  0x2c   :  { %158 = vmatpush.msra.mxu1 %v133_v24  ;;  %116 = vmatpush.msra.mxu0 %v91_v25 }
  0x2e   :  { %159 = vmatpush.msra.mxu1 %v132_v26  ;;  %117 = vmatpush.msra.mxu0 %v90_v27 }
  0x30   :  { %160 = vmatpush.msra.mxu1 %v131_v28  ;;  %118 = vmatpush.msra.mxu0 %v89_v29 }
  0x32   :  { %161 = vmatpush.msra.mxu1 %v130_v30  ;;  %119 = vmatpush.msra.mxu0 %v88_v31 }
  0x33   :  { %162 = vmatmul.f32.vlgmr.msra.gmra.mxu1 %v129_v32  ;;  %120 = vmatmul.f32.vlgmr.msra.gmra.mxu0 %v87_v33 }
  0xb0   :  { %v163_v35 = vpop.f32.mrf.mxu1  ;;  %v121_v36 = vpop.f32.mrf.mxu0 }
  0xb1   :  { %v169_v37 = vmul.f32 %v168_v34, %v163_v35 }
  0xb3   :  { %v170_v38 = vadd.f32 %v169_v37, %v121_v36 }
  0xb5   :  { %171 = vst [vmem:[#allocation12] sm:$0xff] %v170_v38 }
  0xb6   :  { %182 = dma.vmem_to_hbm [thread:$0]  %s178_s14, 128, %s180_s17, [#allocation6]  }
  0xb7   :  { %324 = dma.done.wait [#allocation6], 128  }
  0xb8   :  { %325 = vsyncadd [#allocation6], 4294967168 }
  0xb9   :  { %187 = vsyncpa [#allocation5], 1 }
  0xba   :  { %188 = vsyncpa [#allocation8], 1 }
  0xbb   :  { %189 = vsyncpa [#allocation11], 1 }
  0xbc   :  { %190 = vsyncpa [#allocation6], 1 }

</bundles_post_ra>
